<compile_context>
chip_gen: v5e
topology: v5e:2x2
jax: 0.10.0
libtpu: 0.0.40
codegen_flags: <defaults>
</compile_context>

<pallas_src>
import numpy as np

import jax
import jax.numpy as jnp
from jax.experimental import pallas as pl
from jax.experimental.pallas import tpu as pltpu

EPS = 1e-5  # nn.BatchNorm2d default


def _make_resblock_kernel(W, M):
    """Kernel factory; W (image width) and M (= N*H*W) are static Python ints."""
    inv_m = np.float32(1.0 / M)

    def kernel(x_ref, mask_ref, w1_ref, w2_ref, g1_ref, b1_ref, g2_ref, b2_ref, o_ref):
        x_f32 = x_ref[...]               # (Cp, M) f32 — read once; also the residual
        masks = mask_ref[...]            # (9, M) f32 — per-tap halo validity (replaces jnp.pad)

        def conv3x3(v_f32, w_ref):
            """3x3 conv, stride 1, padding 1 — a single MXU dot (im2col, K = 9*Cp)."""
            parts = []
            for t in range(9):
                dy, dx = t // 3 - 1, t % 3 - 1
                s = dy * W + dx                                  # flat-pixel shift of this tap
                if s == 0:
                    parts.append(v_f32)                          # center tap: no shift, no mask
                else:
                    # patches_t[:, m] = v[:, m + s]; wrap lands only on masked lanes.
                    rolled = pltpu.roll(v_f32, (-s) % M, 1)      # XLU lane rotate
                    parts.append(rolled * masks[t:t + 1, :])     # zero out-of-image taps
            patches = jnp.concatenate(parts, axis=0)             # (9*Cp, M) f32, tile-aligned
            return jnp.dot(w_ref[...], patches.astype(jnp.bfloat16),
                           preferred_element_type=jnp.float32)   # (Cp, M) f32, one dot per conv

        def bn(h, g_ref, b_ref):
            """BatchNorm2d train-mode batch stats (biased var), single reduction pass."""
            s = jnp.sum(h, axis=1, keepdims=True)                # (Cp, 1) f32
            ss = jnp.sum(h * h, axis=1, keepdims=True)
            mean = s * inv_m
            var = ss * inv_m - mean * mean
            scale = g_ref[...] * jax.lax.rsqrt(var + EPS)        # rsqrt -> EUP slot
            shift = b_ref[...] - mean * scale
            return h * scale + shift                             # single FMA normalize pass

        h = jnp.maximum(bn(conv3x3(x_f32, w1_ref), g1_ref, b1_ref), 0.0)  # conv1->bn1->relu
        h = bn(conv3x3(h, w2_ref), g2_ref, b2_ref)                         # conv2->bn2
        o_ref[...] = jnp.maximum(h + x_f32, 0.0).astype(o_ref.dtype)       # +residual -> relu

    return kernel


def _full_spec(shape):
    nd = len(shape)
    return pl.BlockSpec(shape, lambda i, _nd=nd: (0,) * _nd)


def resblock_forward(x_nchw, w1_oihw, w2_oihw, g1, b1, g2, b2):
    """PyTorch-semantics ResBlock forward (stride=1, downsample=None). x_nchw: (N,C,H,W) f32."""
    N, C, H, W = x_nchw.shape
    Cout = w1_oihw.shape[0]
    assert Cout == C, "identity residual requires in_channels == out_channels"
    M = N * H * W
    Cp = ((C + 7) // 8) * 8          # pad channels to a sublane-tile multiple (4 -> 8)

    # Channels on sublanes, flattened (N,H,W) on lanes -> lane-dense compute & output.
    x_flat = jnp.transpose(x_nchw, (1, 0, 2, 3)).reshape(C, M)
    x_flat = jnp.pad(x_flat, ((0, Cp - C), (0, 0)))

    # OIHW -> pad O/I to Cp -> (O, ky, kx, I) -> (Cp, 9*Cp); pre-cast to bf16 for the MXU.
    def pack_w(w):
        wp = jnp.pad(w, ((0, Cp - Cout), (0, Cp - C), (0, 0), (0, 0)))
        return jnp.transpose(wp, (0, 2, 3, 1)).reshape(Cp, 9 * Cp).astype(jnp.bfloat16)

    w1m, w2m = pack_w(w1_oihw), pack_w(w2_oihw)

    def pack_v(v):
        return jnp.pad(v, (0, Cp - Cout)).reshape(Cp, 1)

    g1c, b1c, g2c, b2c = pack_v(g1), pack_v(b1), pack_v(g2), pack_v(b2)

    # Host-precomputed per-flat-pixel validity mask for each of the 9 taps
    # (== the conv's zero padding; replaces jnp.pad / halo reads).
    m_idx = np.arange(M, dtype=np.int64)
    yy = (m_idx // W) % H
    xx = m_idx % W
    masks_np = np.zeros((9, M), np.float32)
    for t in range(9):
        dy, dx = t // 3 - 1, t % 3 - 1
        ok = (yy + dy >= 0) & (yy + dy < H) & (xx + dx >= 0) & (xx + dx < W)
        masks_np[t] = ok
    masks = jnp.asarray(masks_np)

    cost = pl.CostEstimate(
        flops=4 * M * 9 * Cp * Cp + 20 * Cp * M,
        transcendentals=2 * Cp,
        bytes_accessed=2 * (4 * Cp * M) + 4 * 9 * M + 2 * (2 * Cp * 9 * Cp) + 4 * 4 * Cp,
    )

    out_flat = pl.pallas_call(
        _make_resblock_kernel(W, M),
        out_shape=jax.ShapeDtypeStruct((Cp, M), jnp.float32),
        grid=(1,),
        in_specs=[_full_spec(a.shape) for a in (x_flat, masks, w1m, w2m, g1c, b1c, g2c, b2c)],
        out_specs=_full_spec((Cp, M)),
        compiler_params=pltpu.CompilerParams(dimension_semantics=("arbitrary",)),
        cost_estimate=cost,
    )(x_flat, masks, w1m, w2m, g1c, b1c, g2c, b2c)

    out = out_flat[:Cout]
    return jnp.transpose(out.reshape(Cout, N, H, W), (1, 0, 2, 3))  # -> NCHW


def resblock_reference(x, w1, w2, g1, b1, g2, b2):
    """Pure-JAX f32 reference in NCHW, mirroring the PyTorch forward."""
    def conv(h, w):
        return jax.lax.conv_general_dilated(
            h, w, window_strides=(1, 1), padding=((1, 1), (1, 1)),
            dimension_numbers=('NCHW', 'OIHW', 'NCHW'))

    def bn(h, g, b):
        mean = jnp.mean(h, axis=(0, 2, 3), keepdims=True)
        var = jnp.mean((h - mean) ** 2, axis=(0, 2, 3), keepdims=True)
        return ((h - mean) * jax.lax.rsqrt(var + EPS)
                * g.reshape(1, -1, 1, 1) + b.reshape(1, -1, 1, 1))

    out = jax.nn.relu(bn(conv(x, w1), g1, b1))
    out = bn(conv(out, w2), g2, b2)
    return jax.nn.relu(out + x)


if __name__ == "__main__":
    # Small shapes: batch=2, in_channels=out_channels=4, spatial=16 (stride=1, downsample=None).
    N, C, H, W = 2, 4, 16, 16
    key = jax.random.PRNGKey(0)
    kx, kw1, kw2 = jax.random.split(key, 3)

    x = jax.random.normal(kx, (N, C, H, W), dtype=jnp.float32)
    # Conv2d weights (Cout, Cin, 3, 3), bias=False. Deterministic synthetic init.
    w1 = 0.1 * jax.random.normal(kw1, (C, C, 3, 3), dtype=jnp.float32)
    w2 = 0.1 * jax.random.normal(kw2, (C, C, 3, 3), dtype=jnp.float32)
    # BatchNorm2d default init: weight(=gamma)=1, bias(=beta)=0.
    g1 = jnp.ones((C,), jnp.float32)
    b1 = jnp.zeros((C,), jnp.float32)
    g2 = jnp.ones((C,), jnp.float32)
    b2 = jnp.zeros((C,), jnp.float32)

    out = resblock_forward(x, w1, w2, g1, b1, g2, b2)
    out = jax.block_until_ready(out)

    ref = resblock_reference(x, w1, w2, g1, b1, g2, b2)
    assert out.shape == (N, C, H, W), out.shape
    # bf16 MXU feed through two conv+BN stages -> compare at bf16-level tolerance.
    assert jnp.allclose(out, ref, rtol=5e-2, atol=5e-2), float(jnp.max(jnp.abs(out - ref)))

    print("KERNEL_OK")
</pallas_src>

<mosaic_0001>
module attributes {stable_mosaic.version = 11 : i64} {
  func.func @kernel(%arg0: i32, %arg1: memref<8x512xf32, #tpu.memory_space<vmem>>, %arg2: memref<9x512xf32, #tpu.memory_space<vmem>>, %arg3: memref<8x72xbf16, #tpu.memory_space<vmem>>, %arg4: memref<8x72xbf16, #tpu.memory_space<vmem>>, %arg5: memref<8x1xf32, #tpu.memory_space<vmem>>, %arg6: memref<8x1xf32, #tpu.memory_space<vmem>>, %arg7: memref<8x1xf32, #tpu.memory_space<vmem>>, %arg8: memref<8x1xf32, #tpu.memory_space<vmem>>, %arg9: memref<8x512xf32, #tpu.memory_space<vmem>>) attributes {dimension_semantics = [#tpu.dimension_semantics<arbitrary>], iteration_bounds = array<i64: 1>, scalar_prefetch = 0 : i64, scratch_operands = 0 : i64, tpu.core_type = #tpu.core_type<tc>, window_params = [{pipeline_mode = #tpu.pipeline_mode<synchronous>, transform_indices = @transform_0, window_bounds = array<i64: 8, 512>}, {pipeline_mode = #tpu.pipeline_mode<synchronous>, transform_indices = @transform_1, window_bounds = array<i64: 9, 512>}, {pipeline_mode = #tpu.pipeline_mode<synchronous>, transform_indices = @transform_2, window_bounds = array<i64: 8, 72>}, {pipeline_mode = #tpu.pipeline_mode<synchronous>, transform_indices = @transform_3, window_bounds = array<i64: 8, 72>}, {pipeline_mode = #tpu.pipeline_mode<synchronous>, transform_indices = @transform_4, window_bounds = array<i64: 8, 1>}, {pipeline_mode = #tpu.pipeline_mode<synchronous>, transform_indices = @transform_5, window_bounds = array<i64: 8, 1>}, {pipeline_mode = #tpu.pipeline_mode<synchronous>, transform_indices = @transform_6, window_bounds = array<i64: 8, 1>}, {pipeline_mode = #tpu.pipeline_mode<synchronous>, transform_indices = @transform_7, window_bounds = array<i64: 8, 1>}, {pipeline_mode = #tpu.pipeline_mode<synchronous>, transform_indices = @transform_8, window_bounds = array<i64: 8, 512>}]} {
    %c0 = arith.constant 0 : index
    %c0_0 = arith.constant 0 : index
    %0 = vector.load %arg1[%c0, %c0_0] : memref<8x512xf32, #tpu.memory_space<vmem>>, vector<8x512xf32>
    %c0_1 = arith.constant 0 : index
    %c0_2 = arith.constant 0 : index
    %1 = vector.load %arg2[%c0_1, %c0_2] : memref<9x512xf32, #tpu.memory_space<vmem>>, vector<9x512xf32>
    %c17_i32 = arith.constant 17 : i32
    %2 = tpu.dynamic_rotate %0 by %c17_i32 dim 1 : vector<8x512xf32>, i32 -> vector<8x512xf32>
    %3 = vector.extract_strided_slice %1 {offsets = [0, 0], sizes = [1, 512], strides = [1, 1]} : vector<9x512xf32> to vector<1x512xf32>
    %4 = vector.broadcast %3 : vector<1x512xf32> to vector<8x512xf32>
    %5 = arith.mulf %2, %4 : vector<8x512xf32>
    %c16_i32 = arith.constant 16 : i32
    %6 = tpu.dynamic_rotate %0 by %c16_i32 dim 1 : vector<8x512xf32>, i32 -> vector<8x512xf32>
    %7 = vector.extract_strided_slice %1 {offsets = [1, 0], sizes = [1, 512], strides = [1, 1]} : vector<9x512xf32> to vector<1x512xf32>
    %8 = vector.broadcast %7 : vector<1x512xf32> to vector<8x512xf32>
    %9 = arith.mulf %6, %8 : vector<8x512xf32>
    %c15_i32 = arith.constant 15 : i32
    %10 = tpu.dynamic_rotate %0 by %c15_i32 dim 1 : vector<8x512xf32>, i32 -> vector<8x512xf32>
    %11 = vector.extract_strided_slice %1 {offsets = [2, 0], sizes = [1, 512], strides = [1, 1]} : vector<9x512xf32> to vector<1x512xf32>
    %12 = vector.broadcast %11 : vector<1x512xf32> to vector<8x512xf32>
    %13 = arith.mulf %10, %12 : vector<8x512xf32>
    %c1_i32 = arith.constant 1 : i32
    %14 = tpu.dynamic_rotate %0 by %c1_i32 dim 1 : vector<8x512xf32>, i32 -> vector<8x512xf32>
    %15 = vector.extract_strided_slice %1 {offsets = [3, 0], sizes = [1, 512], strides = [1, 1]} : vector<9x512xf32> to vector<1x512xf32>
    %16 = vector.broadcast %15 : vector<1x512xf32> to vector<8x512xf32>
    %17 = arith.mulf %14, %16 : vector<8x512xf32>
    %c511_i32 = arith.constant 511 : i32
    %18 = tpu.dynamic_rotate %0 by %c511_i32 dim 1 : vector<8x512xf32>, i32 -> vector<8x512xf32>
    %19 = vector.extract_strided_slice %1 {offsets = [5, 0], sizes = [1, 512], strides = [1, 1]} : vector<9x512xf32> to vector<1x512xf32>
    %20 = vector.broadcast %19 : vector<1x512xf32> to vector<8x512xf32>
    %21 = arith.mulf %18, %20 : vector<8x512xf32>
    %c497_i32 = arith.constant 497 : i32
    %22 = tpu.dynamic_rotate %0 by %c497_i32 dim 1 : vector<8x512xf32>, i32 -> vector<8x512xf32>
    %23 = vector.extract_strided_slice %1 {offsets = [6, 0], sizes = [1, 512], strides = [1, 1]} : vector<9x512xf32> to vector<1x512xf32>
    %24 = vector.broadcast %23 : vector<1x512xf32> to vector<8x512xf32>
    %25 = arith.mulf %22, %24 : vector<8x512xf32>
    %c496_i32 = arith.constant 496 : i32
    %26 = tpu.dynamic_rotate %0 by %c496_i32 dim 1 : vector<8x512xf32>, i32 -> vector<8x512xf32>
    %27 = vector.extract_strided_slice %1 {offsets = [7, 0], sizes = [1, 512], strides = [1, 1]} : vector<9x512xf32> to vector<1x512xf32>
    %28 = vector.broadcast %27 : vector<1x512xf32> to vector<8x512xf32>
    %29 = arith.mulf %26, %28 : vector<8x512xf32>
    %c495_i32 = arith.constant 495 : i32
    %30 = tpu.dynamic_rotate %0 by %c495_i32 dim 1 : vector<8x512xf32>, i32 -> vector<8x512xf32>
    %31 = vector.extract_strided_slice %1 {offsets = [8, 0], sizes = [1, 512], strides = [1, 1]} : vector<9x512xf32> to vector<1x512xf32>
    %32 = vector.broadcast %31 : vector<1x512xf32> to vector<8x512xf32>
    %33 = arith.mulf %30, %32 : vector<8x512xf32>
    %34 = tpu.concatenate %5, %9, %13, %17, %0, %21, %25, %29, %33 in 0 : vector<8x512xf32>, vector<8x512xf32>, vector<8x512xf32>, vector<8x512xf32>, vector<8x512xf32>, vector<8x512xf32>, vector<8x512xf32>, vector<8x512xf32>, vector<8x512xf32> -> vector<72x512xf32>
    %c0_3 = arith.constant 0 : index
    %c0_4 = arith.constant 0 : index
    %35 = vector.load %arg3[%c0_3, %c0_4] : memref<8x72xbf16, #tpu.memory_space<vmem>>, vector<8x72xbf16>
    %36 = arith.truncf %34 : vector<72x512xf32> to vector<72x512xbf16>
    %cst = arith.constant dense<0.000000e+00> : vector<8x512xf32>
    %37 = tpu.matmul %35, %36, %cst {dimension_numbers = #tpu.dot_dimension_numbers<[1], [0], [0], [1], [0, 0, 1, 1], [], []>} : vector<8x72xbf16>, vector<72x512xbf16>, vector<8x512xf32> -> vector<8x512xf32>
    %cst_5 = arith.constant dense<0.000000e+00> : vector<8xf32>
    %38 = vector.multi_reduction <add>, %37, %cst_5 [1] : vector<8x512xf32> to vector<8xf32>
    %39 = vector.shape_cast %38 : vector<8xf32> to vector<8x1xf32>
    %40 = arith.mulf %37, %37 : vector<8x512xf32>
    %cst_6 = arith.constant dense<0.000000e+00> : vector<8xf32>
    %41 = vector.multi_reduction <add>, %40, %cst_6 [1] : vector<8x512xf32> to vector<8xf32>
    %42 = vector.shape_cast %41 : vector<8xf32> to vector<8x1xf32>
    %cst_7 = arith.constant 0.001953125 : f32
    %43 = vector.broadcast %cst_7 : f32 to vector<8x1xf32>
    %44 = arith.mulf %39, %43 : vector<8x1xf32>
    %cst_8 = arith.constant 0.001953125 : f32
    %45 = vector.broadcast %cst_8 : f32 to vector<8x1xf32>
    %46 = arith.mulf %42, %45 : vector<8x1xf32>
    %47 = arith.mulf %44, %44 : vector<8x1xf32>
    %48 = arith.subf %46, %47 : vector<8x1xf32>
    %c0_9 = arith.constant 0 : index
    %c0_10 = arith.constant 0 : index
    %49 = vector.load %arg5[%c0_9, %c0_10] : memref<8x1xf32, #tpu.memory_space<vmem>>, vector<8x1xf32>
    %cst_11 = arith.constant 9.99999974E-6 : f32
    %50 = vector.broadcast %cst_11 : f32 to vector<8x1xf32>
    %51 = arith.addf %48, %50 : vector<8x1xf32>
    %52 = math.rsqrt %51 : vector<8x1xf32>
    %53 = arith.mulf %49, %52 : vector<8x1xf32>
    %c0_12 = arith.constant 0 : index
    %c0_13 = arith.constant 0 : index
    %54 = vector.load %arg6[%c0_12, %c0_13] : memref<8x1xf32, #tpu.memory_space<vmem>>, vector<8x1xf32>
    %55 = arith.mulf %44, %53 : vector<8x1xf32>
    %56 = arith.subf %54, %55 : vector<8x1xf32>
    %57 = vector.broadcast %53 : vector<8x1xf32> to vector<8x512xf32>
    %58 = arith.mulf %37, %57 : vector<8x512xf32>
    %59 = vector.broadcast %56 : vector<8x1xf32> to vector<8x512xf32>
    %60 = arith.addf %58, %59 : vector<8x512xf32>
    %cst_14 = arith.constant 0.000000e+00 : f32
    %61 = vector.broadcast %cst_14 : f32 to vector<8x512xf32>
    %62 = arith.maximumf %60, %61 : vector<8x512xf32>
    %c17_i32_15 = arith.constant 17 : i32
    %63 = tpu.dynamic_rotate %62 by %c17_i32_15 dim 1 : vector<8x512xf32>, i32 -> vector<8x512xf32>
    %64 = vector.extract_strided_slice %1 {offsets = [0, 0], sizes = [1, 512], strides = [1, 1]} : vector<9x512xf32> to vector<1x512xf32>
    %65 = vector.broadcast %64 : vector<1x512xf32> to vector<8x512xf32>
    %66 = arith.mulf %63, %65 : vector<8x512xf32>
    %c16_i32_16 = arith.constant 16 : i32
    %67 = tpu.dynamic_rotate %62 by %c16_i32_16 dim 1 : vector<8x512xf32>, i32 -> vector<8x512xf32>
    %68 = vector.extract_strided_slice %1 {offsets = [1, 0], sizes = [1, 512], strides = [1, 1]} : vector<9x512xf32> to vector<1x512xf32>
    %69 = vector.broadcast %68 : vector<1x512xf32> to vector<8x512xf32>
    %70 = arith.mulf %67, %69 : vector<8x512xf32>
    %c15_i32_17 = arith.constant 15 : i32
    %71 = tpu.dynamic_rotate %62 by %c15_i32_17 dim 1 : vector<8x512xf32>, i32 -> vector<8x512xf32>
    %72 = vector.extract_strided_slice %1 {offsets = [2, 0], sizes = [1, 512], strides = [1, 1]} : vector<9x512xf32> to vector<1x512xf32>
    %73 = vector.broadcast %72 : vector<1x512xf32> to vector<8x512xf32>
    %74 = arith.mulf %71, %73 : vector<8x512xf32>
    %c1_i32_18 = arith.constant 1 : i32
    %75 = tpu.dynamic_rotate %62 by %c1_i32_18 dim 1 : vector<8x512xf32>, i32 -> vector<8x512xf32>
    %76 = vector.extract_strided_slice %1 {offsets = [3, 0], sizes = [1, 512], strides = [1, 1]} : vector<9x512xf32> to vector<1x512xf32>
    %77 = vector.broadcast %76 : vector<1x512xf32> to vector<8x512xf32>
    %78 = arith.mulf %75, %77 : vector<8x512xf32>
    %c511_i32_19 = arith.constant 511 : i32
    %79 = tpu.dynamic_rotate %62 by %c511_i32_19 dim 1 : vector<8x512xf32>, i32 -> vector<8x512xf32>
    %80 = vector.extract_strided_slice %1 {offsets = [5, 0], sizes = [1, 512], strides = [1, 1]} : vector<9x512xf32> to vector<1x512xf32>
    %81 = vector.broadcast %80 : vector<1x512xf32> to vector<8x512xf32>
    %82 = arith.mulf %79, %81 : vector<8x512xf32>
    %c497_i32_20 = arith.constant 497 : i32
    %83 = tpu.dynamic_rotate %62 by %c497_i32_20 dim 1 : vector<8x512xf32>, i32 -> vector<8x512xf32>
    %84 = vector.extract_strided_slice %1 {offsets = [6, 0], sizes = [1, 512], strides = [1, 1]} : vector<9x512xf32> to vector<1x512xf32>
    %85 = vector.broadcast %84 : vector<1x512xf32> to vector<8x512xf32>
    %86 = arith.mulf %83, %85 : vector<8x512xf32>
    %c496_i32_21 = arith.constant 496 : i32
    %87 = tpu.dynamic_rotate %62 by %c496_i32_21 dim 1 : vector<8x512xf32>, i32 -> vector<8x512xf32>
    %88 = vector.extract_strided_slice %1 {offsets = [7, 0], sizes = [1, 512], strides = [1, 1]} : vector<9x512xf32> to vector<1x512xf32>
    %89 = vector.broadcast %88 : vector<1x512xf32> to vector<8x512xf32>
    %90 = arith.mulf %87, %89 : vector<8x512xf32>
    %c495_i32_22 = arith.constant 495 : i32
    %91 = tpu.dynamic_rotate %62 by %c495_i32_22 dim 1 : vector<8x512xf32>, i32 -> vector<8x512xf32>
    %92 = vector.extract_strided_slice %1 {offsets = [8, 0], sizes = [1, 512], strides = [1, 1]} : vector<9x512xf32> to vector<1x512xf32>
    %93 = vector.broadcast %92 : vector<1x512xf32> to vector<8x512xf32>
    %94 = arith.mulf %91, %93 : vector<8x512xf32>
    %95 = tpu.concatenate %66, %70, %74, %78, %62, %82, %86, %90, %94 in 0 : vector<8x512xf32>, vector<8x512xf32>, vector<8x512xf32>, vector<8x512xf32>, vector<8x512xf32>, vector<8x512xf32>, vector<8x512xf32>, vector<8x512xf32>, vector<8x512xf32> -> vector<72x512xf32>
    %c0_23 = arith.constant 0 : index
    %c0_24 = arith.constant 0 : index
    %96 = vector.load %arg4[%c0_23, %c0_24] : memref<8x72xbf16, #tpu.memory_space<vmem>>, vector<8x72xbf16>
    %97 = arith.truncf %95 : vector<72x512xf32> to vector<72x512xbf16>
    %cst_25 = arith.constant dense<0.000000e+00> : vector<8x512xf32>
    %98 = tpu.matmul %96, %97, %cst_25 {dimension_numbers = #tpu.dot_dimension_numbers<[1], [0], [0], [1], [0, 0, 1, 1], [], []>} : vector<8x72xbf16>, vector<72x512xbf16>, vector<8x512xf32> -> vector<8x512xf32>
    %cst_26 = arith.constant dense<0.000000e+00> : vector<8xf32>
    %99 = vector.multi_reduction <add>, %98, %cst_26 [1] : vector<8x512xf32> to vector<8xf32>
    %100 = vector.shape_cast %99 : vector<8xf32> to vector<8x1xf32>
    %101 = arith.mulf %98, %98 : vector<8x512xf32>
    %cst_27 = arith.constant dense<0.000000e+00> : vector<8xf32>
    %102 = vector.multi_reduction <add>, %101, %cst_27 [1] : vector<8x512xf32> to vector<8xf32>
    %103 = vector.shape_cast %102 : vector<8xf32> to vector<8x1xf32>
    %cst_28 = arith.constant 0.001953125 : f32
    %104 = vector.broadcast %cst_28 : f32 to vector<8x1xf32>
    %105 = arith.mulf %100, %104 : vector<8x1xf32>
    %cst_29 = arith.constant 0.001953125 : f32
    %106 = vector.broadcast %cst_29 : f32 to vector<8x1xf32>
    %107 = arith.mulf %103, %106 : vector<8x1xf32>
    %108 = arith.mulf %105, %105 : vector<8x1xf32>
    %109 = arith.subf %107, %108 : vector<8x1xf32>
    %c0_30 = arith.constant 0 : index
    %c0_31 = arith.constant 0 : index
    %110 = vector.load %arg7[%c0_30, %c0_31] : memref<8x1xf32, #tpu.memory_space<vmem>>, vector<8x1xf32>
    %cst_32 = arith.constant 9.99999974E-6 : f32
    %111 = vector.broadcast %cst_32 : f32 to vector<8x1xf32>
    %112 = arith.addf %109, %111 : vector<8x1xf32>
    %113 = math.rsqrt %112 : vector<8x1xf32>
    %114 = arith.mulf %110, %113 : vector<8x1xf32>
    %c0_33 = arith.constant 0 : index
    %c0_34 = arith.constant 0 : index
    %115 = vector.load %arg8[%c0_33, %c0_34] : memref<8x1xf32, #tpu.memory_space<vmem>>, vector<8x1xf32>
    %116 = arith.mulf %105, %114 : vector<8x1xf32>
    %117 = arith.subf %115, %116 : vector<8x1xf32>
    %118 = vector.broadcast %114 : vector<8x1xf32> to vector<8x512xf32>
    %119 = arith.mulf %98, %118 : vector<8x512xf32>
    %120 = vector.broadcast %117 : vector<8x1xf32> to vector<8x512xf32>
    %121 = arith.addf %119, %120 : vector<8x512xf32>
    %122 = arith.addf %121, %0 : vector<8x512xf32>
    %cst_35 = arith.constant 0.000000e+00 : f32
    %123 = vector.broadcast %cst_35 : f32 to vector<8x512xf32>
    %124 = arith.maximumf %122, %123 : vector<8x512xf32>
    %c0_36 = arith.constant 0 : index
    %c0_37 = arith.constant 0 : index
    %125 = vector.load %arg9[%c0_36, %c0_37] : memref<8x512xf32, #tpu.memory_space<vmem>>, vector<8x512xf32>
    tpu.vector_store %arg9[%c0_36, %c0_37], %124 {strides = array<i32>} : memref<8x512xf32, #tpu.memory_space<vmem>>, vector<8x512xf32>,
    return
  }
  func.func @transform_0(%arg0: i32) -> (i32, i32) {
    %c0_i32 = arith.constant 0 : i32
    %c0_i32_0 = arith.constant 0 : i32
    %c0_i32_1 = arith.constant 0 : i32
    return %c0_i32, %c0_i32_0 : i32, i32
  }
  func.func @transform_1(%arg0: i32) -> (i32, i32) {
    %c0_i32 = arith.constant 0 : i32
    %c0_i32_0 = arith.constant 0 : i32
    %c0_i32_1 = arith.constant 0 : i32
    return %c0_i32, %c0_i32_0 : i32, i32
  }
  func.func @transform_2(%arg0: i32) -> (i32, i32) {
    %c0_i32 = arith.constant 0 : i32
    %c0_i32_0 = arith.constant 0 : i32
    %c0_i32_1 = arith.constant 0 : i32
    return %c0_i32, %c0_i32_0 : i32, i32
  }
  func.func @transform_3(%arg0: i32) -> (i32, i32) {
    %c0_i32 = arith.constant 0 : i32
    %c0_i32_0 = arith.constant 0 : i32
    %c0_i32_1 = arith.constant 0 : i32
    return %c0_i32, %c0_i32_0 : i32, i32
  }
  func.func @transform_4(%arg0: i32) -> (i32, i32) {
    %c0_i32 = arith.constant 0 : i32
    %c0_i32_0 = arith.constant 0 : i32
    %c0_i32_1 = arith.constant 0 : i32
    return %c0_i32, %c0_i32_0 : i32, i32
  }
  func.func @transform_5(%arg0: i32) -> (i32, i32) {
    %c0_i32 = arith.constant 0 : i32
    %c0_i32_0 = arith.constant 0 : i32
    %c0_i32_1 = arith.constant 0 : i32
    return %c0_i32, %c0_i32_0 : i32, i32
  }
  func.func @transform_6(%arg0: i32) -> (i32, i32) {
    %c0_i32 = arith.constant 0 : i32
    %c0_i32_0 = arith.constant 0 : i32
    %c0_i32_1 = arith.constant 0 : i32
    return %c0_i32, %c0_i32_0 : i32, i32
  }
  func.func @transform_7(%arg0: i32) -> (i32, i32) {
    %c0_i32 = arith.constant 0 : i32
    %c0_i32_0 = arith.constant 0 : i32
    %c0_i32_1 = arith.constant 0 : i32
    return %c0_i32, %c0_i32_0 : i32, i32
  }
  func.func @transform_8(%arg0: i32) -> (i32, i32) {
    %c0_i32 = arith.constant 0 : i32
    %c0_i32_0 = arith.constant 0 : i32
    %c0_i32_1 = arith.constant 0 : i32
    return %c0_i32, %c0_i32_0 : i32, i32
  }
}

</mosaic_0001>

<bundles_post_ra>
// kernel: tpu_custom_call.1
= control target key start
LH: loop header
LB: loop body
LE: loop exit
PB: predicated region body
PF: predicated region fallthrough
CT: control target
= control target key end

     0   :  { %13 = vsyncpa [#allocation3], 0  ;;  %s1402_s0 = inlined_call_operand.vmem [shape: f32[8,512], index: 0, kind: input, shape index: {}]   ;;  %s1403_s1 = inlined_call_operand.hbm [shape: f32[9,512], index: 1, kind: input, shape index: {}]   ;;  %s1404_s2 = inlined_call_operand.vmem [shape: bf16[8,72], index: 2, kind: input, shape index: {}]   ;;  %s1405_s3 = inlined_call_operand.hbm [shape: bf16[8,72], index: 3, kind: input, shape index: {}]   ;;  %s1406_s4 = inlined_call_operand.vmem [shape: f32[8,1], index: 4, kind: input, shape index: {}]   ;;  %s1407_s5 = inlined_call_operand.vmem [shape: f32[8,1], index: 5, kind: input, shape index: {}]   ;;  %s1408_s6 = inlined_call_operand.vmem [shape: f32[8,1], index: 6, kind: input, shape index: {}]   ;;  %s1409_s7 = inlined_call_operand.vmem [shape: f32[8,1], index: 7, kind: input, shape index: {}]   ;;  %s1410_s8 = inlined_call_operand.hbm [shape: f32[8,512], index: 8, kind: output, shape index: {}]  }
   0x1   :  { %14 = vsyncpa [#allocation6], 0 }
   0x2   :  { %15 = vsyncpa [#allocation4], 0  ;;  %s22_s29 = sshll.u32 %s1403_s1, 4  ;;  %s801_s30 = smov [#allocation2]   ;;  %s23_s29 = int_to_ptr.hbm [resolvable:$true] %s22_s29 }
   0x3   :  { %s24_s9 = sshll.u32 %s801_s30, 4  ;;  %s38_s12 = sshll.u32 %s1405_s3, 4  ;;  %s25_s9 = int_to_ptr.vmem [resolvable:$true] %s24_s9  ;;  %s39_s12 = int_to_ptr.hbm [resolvable:$true] %s38_s12 }
   0x4   :  { %s802_s13 = smov 512   ;;  %s803_s14 = smov 32  }
   0x5   :  { %30 = dma.hbm_to_vmem [thread:$0]  %s23_s29, 1024, %s25_s9, [#allocation3], %s802_s13, %s802_s13, %s803_s14  }
   0x6   :  { %s804_s15 = smov [#allocation5]  }
   0x7   :  { %s40_s16 = sshll.u32 %s804_s15, 4  ;;  %s41_s16 = int_to_ptr.vmem [resolvable:$true] %s40_s16 }
   0x8   :  { %43 = dma.hbm_to_vmem [thread:$0]  %s39_s12, 64, %s41_s16, [#allocation6]  }
   0x9   :  { %795 = dma.done.wait [#allocation3], 1024  }
   0xa   :  { %796 = vsyncadd [#allocation3], 4294966272 }
   0xb   :  { %797 = dma.done.wait [#allocation6], 64  }
   0xc   :  { %798 = vsyncadd [#allocation6], 4294967232  ;;  %v869_v0 = vld [vmem:[%s1402_s0 + $0x10] sm:$0xff]  ;;  %v874_v1 = vld [vmem:[%s1402_s0] sm:$0xff]  ;;  %s805_s3 = smov 113   ;;  %s806_s20 = smov 111   ;;  %v81_v6 = vlaneseq }
   0xd   :  { %184 = vrot.lane.b32.xlu2 %v869_v0, %s805_s3  ;;  %226 = vrot.lane.b32.xlu0 %v869_v0, %s806_s20  ;;  %v885_v2 = vld [vmem:[%s1402_s0 + $0x18] sm:$0xff]  ;;  %v890_v3 = vld [vmem:[%s1402_s0 + $0x8] sm:$0xff]  ;;  %s807_s25 = smov 112   ;;  %s808_s26 = smov 127   ;;  %v957_v11 = vld [vmem:[#allocation2 + $0x30] ss:$0 sm:$0xff] }
   0xe   :  { %222 = vrot.lane.b32.xlu1 %v874_v1, %s806_s20  ;;  %s809_s27 = smov 15   ;;  %s810_s28 = smov 1   ;;  %v954_v10 = vand.u32 127, %v81_v6  ;;  %v959_v12 = vld [vmem:[#allocation2 + $0x20] ss:$0 sm:$0xff]  ;;  %v974_v22 = vld [vmem:[#allocation2 + $0x10] sm:$0xff] }
   0xf   :  { %s811_s29 = smov 17   ;;  %s812_s30 = smov 16   ;;  %v961_v13 = vld [vmem:[#allocation2 + $0x28] ss:$0 sm:$0xff]  ;;  %v963_v14 = vld [vmem:[#allocation2 + $0x38] ss:$0 sm:$0xff] }
  0x10   :  { %vm230_vm0 = vcmp.lt.s32.totalorder %v954_v10, 111  ;;  %vm268_vm1 = vcmask 1043456   ;;  %vm188_vm2 = vcmp.lt.s32.totalorder %v954_v10, 113  ;;  %v195_v31 = vperm.slane %v974_v22, 6  ;;  %v994_v42 = vld [vmem:[#allocation2 + $0x18] sm:$0xff]  ;;  %v1020_v60 = vld [vmem:[#allocation2] sm:$0xff] }
  0x11   :  { %vm209_vm3 = vcmp.lt.s32.totalorder %v954_v10, 112  ;;  %v216_v36 = vperm.slane %v974_v22, 7  ;;  %v196_v46 = vperm.slane %v994_v42, 6  ;;  %vm167_vm4 = vcmp.lt.s32.totalorder %v954_v10, 127  ;;  %v1022_v61 = vld [vmem:[#allocation2 + $0x8] sm:$0xff]  ;;  %s676_s24 = sshll.u32 %s1410_s8, 4  ;;  %s677_s24 = int_to_ptr.hbm [resolvable:$true] %s676_s24 }
  0x12   :  { %v175_v47 = vperm.slane %v994_v42, 5  ;;  %v217_v48 = vperm.slane %v994_v42, 7  ;;  %v174_v51 = vperm.slane %v974_v22, 5  ;;  %v194_v6 = vperm.slane %v1022_v61, 6 }
  0x13   :  { %vm125_vm5 = vcmp.lt.s32.totalorder %v954_v10, 15  ;;  %vm146_vm6 = vcmp.lt.s32.totalorder %v954_v10, 1  ;;  %vm83_vm7 = vcmp.lt.s32.totalorder %v954_v10, 17  ;;  %vm104_vm8 = vcmp.lt.s32.totalorder %v954_v10, 16 }
  0x14   :  { %vm264_vm9 = vcmask 588800  }
  0x15   :  { %186 = vrot.lane.b32.xlu2 %v885_v2, %s805_s3  ;;  %228 = vrot.lane.b32.xlu0 %v885_v2, %s806_s20 }
  0x16   :  { %224 = vrot.lane.b32.xlu1 %v890_v3, %s806_s20 }
  0x1d   :  { %205 = vrot.lane.b32.xlu0 %v869_v0, %s807_s25  ;;  %180 = vrot.lane.b32.xlu2 %v874_v1, %s805_s3 }
  0x1e   :  { %207 = vrot.lane.b32.xlu1 %v885_v2, %s807_s25 }
  0x25   :  { %201 = vrot.lane.b32.xlu0 %v874_v1, %s807_s25  ;;  %165 = vrot.lane.b32.xlu2 %v885_v2, %s808_s26 }
  0x26   :  { %163 = vrot.lane.b32.xlu1 %v869_v0, %s808_s26 }
  0x2d   :  { %182 = vrot.lane.b32.xlu0 %v890_v3, %s805_s3  ;;  %159 = vrot.lane.b32.xlu2 %v874_v1, %s808_s26 }
  0x2e   :  { %203 = vrot.lane.b32.xlu1 %v890_v3, %s807_s25 }
  0x35   :  { %119 = vrot.lane.b32.xlu0 %v890_v3, %s809_s27  ;;  %140 = vrot.lane.b32.xlu2 %v890_v3, %s810_s28 }
  0x36   :  { %121 = vrot.lane.b32.xlu1 %v869_v0, %s809_s27 }
  0x3d   :  { %142 = vrot.lane.b32.xlu0 %v869_v0, %s810_s28  ;;  %123 = vrot.lane.b32.xlu2 %v885_v2, %s809_s27 }
  0x3e   :  { %161 = vrot.lane.b32.xlu1 %v890_v3, %s808_s26 }
  0x45   :  { %144 = vrot.lane.b32.xlu0 %v885_v2, %s810_s28  ;;  %77 = vrot.lane.b32.xlu2 %v869_v0, %s811_s29 }
  0x46   :  { %75 = vrot.lane.b32.xlu1 %v890_v3, %s811_s29 }
  0x4d   :  { %98 = vrot.lane.b32.xlu0 %v890_v3, %s812_s30  ;;  %117 = vrot.lane.b32.xlu2 %v874_v1, %s809_s27 }
  0x4e   :  { %100 = vrot.lane.b32.xlu1 %v869_v0, %s812_s30 }
  0x55   :  { %138 = vrot.lane.b32.xlu0 %v874_v1, %s810_s28  ;;  %102 = vrot.lane.b32.xlu2 %v885_v2, %s812_s30 }
  0x56   :  { %79 = vrot.lane.b32.xlu1 %v885_v2, %s811_s29 }
  0x5d   :  { %73 = vrot.lane.b32.xlu0 %v874_v1, %s811_s29 }
  0x5e   :  { %96 = vrot.lane.b32.xlu1 %v874_v1, %s812_s30 }
  0x67   :  { %v950_v4 = vpop.permute.xlu2 %184 }
  0x6f   :  { %v187_v5 = vpop.permute.xlu2 %186 }
  0x70   :  { %v189_v37 = vsel %vm188_vm2, %v950_v4, %v187_v5 }
  0x71   :  { %v199_v41 = vmul.f32 %v195_v31, %v189_v37 }
  0x77   :  { %v952_v8 = vpop.permute.xlu2 %180 }
  0x78   :  { %v192_v49 = vsel %vm188_vm2, %v187_v5, %v952_v8  ;;  %v193_v5 = vperm.slane %v1020_v60, 6 }
  0x79   :  { %v200_v55 = vmul.f32 %v196_v46, %v192_v49 }
  0x7f   :  { %v227_v7 = vpop.permute.xlu0 %226  ;;  %v166_v23 = vpop.permute.xlu2 %165 }
  0x80   :  { %v223_v9 = vpop.permute.xlu1 %222 }
  0x87   :  { %v229_v15 = vpop.permute.xlu0 %228  ;;  %v160_v44 = vpop.permute.xlu2 %159 }
  0x88   :  { %v231_v16 = vsel %vm230_vm0, %v227_v7, %v229_v15  ;;  %v234_v17 = vsel %vm230_vm0, %v229_v15, %v223_v9  ;;  %v225_v18 = vpop.permute.xlu1 %224  ;;  %v171_v50 = vsel %vm167_vm4, %v166_v23, %v160_v44  ;;  %v214_v15 = vperm.slane %v1020_v60, 7 }
  0x89   :  { %v232_v19 = vsel %vm230_vm0, %v225_v18, %v227_v7  ;;  %v233_v20 = vsel %vm230_vm0, %v223_v9, %v225_v18  ;;  %v241_v21 = vmul.f32 %v957_v11, %v231_v16  ;;  %v242_v26 = vmul.f32 %v963_v14, %v234_v17 }
  0x8a   :  { %v239_v24 = vmul.f32 %v959_v12, %v233_v20  ;;  %v240_v25 = vmul.f32 %v961_v13, %v232_v19  ;;  %v179_v56 = vmul.f32 %v175_v47, %v171_v50  ;;  %v215_v16 = vperm.slane %v1022_v61, 7 }
  0x8b   :  { %v262_v27 = vpack.c.bf16 %v241_v21, %v241_v21  ;;  %v263_v30 = vpack.c.bf16 %v242_v26, %v242_v26 }
  0x8c   :  { %v260_v28 = vpack.c.bf16 %v239_v24, %v239_v24  ;;  %v261_v29 = vpack.c.bf16 %v240_v25, %v240_v25  ;;  %v255_v7 = vpack.c.bf16 %v179_v56, %v885_v2  ;;  %v133_v56 = vperm.slane %v994_v42, 2 }
  0x8d   :  { %v276_v32 = vsel %vm268_vm1, %v262_v27, 0  ;;  %v279_v35 = vsel %vm268_vm1, %v263_v30, 0  ;;  %v153_v30 = vperm.slane %v974_v22, 3 }
  0x8e   :  { %v270_v33 = vsel %vm268_vm1, %v260_v28, 0  ;;  %v273_v34 = vsel %vm268_vm1, %v261_v29, 0  ;;  %310 = vmatpush.bf16.msra.mxu2 %v276_v32  ;;  %323 = vmatpush.bf16.msra.mxu3 %v279_v35  ;;  %v132_v29 = vperm.slane %v974_v22, 2 }
  0x8f   :  { %284 = vmatpush.bf16.msra.mxu0 %v270_v33  ;;  %297 = vmatpush.bf16.msra.mxu1 %v273_v34  ;;  %v206_v38 = vpop.permute.xlu0 %205  ;;  %v1028_v9 = vpop.permute.xlu2 %140  ;;  %v172_v33 = vperm.slane %v1020_v60, 5  ;;  %v173_v34 = vperm.slane %v1022_v61, 5 }
  0x90   :  { %v208_v39 = vpop.permute.xlu1 %207 }
  0x91   :  { %v210_v40 = vsel %vm209_vm3, %v206_v38, %v208_v39 }
  0x92   :  { %v220_v43 = vmul.f32 %v216_v36, %v210_v40 }
  0x94   :  { %v258_v45 = vpack.c.bf16 %v220_v43, %v199_v41 }
  0x96   :  { %311 = vmatpush.bf16.msra.mxu2 %v258_v45 }
  0x97   :  { %v202_v52 = vpop.permute.xlu0 %201  ;;  %v124_v27 = vpop.permute.xlu2 %123 }
  0x98   :  { %v213_v53 = vsel %vm209_vm3, %v208_v39, %v202_v52  ;;  %v164_v54 = vpop.permute.xlu1 %163 }
  0x99   :  { %v221_v57 = vmul.f32 %v217_v48, %v213_v53  ;;  %v168_v58 = vsel %vm167_vm4, %v164_v54, %v166_v23 }
  0x9a   :  { %v178_v59 = vmul.f32 %v174_v51, %v168_v58 }
  0x9b   :  { %v259_v62 = vpack.c.bf16 %v221_v57, %v200_v55 }
  0x9c   :  { %v254_v63 = vpack.c.bf16 %v178_v59, %v869_v0 }
  0x9d   :  { %324 = vmatpush.bf16.msra.mxu3 %v259_v62 }
  0x9e   :  { %312 = vmatpush.bf16.msra.mxu2 %v254_v63 }
  0x9f   :  { %v183_v17 = vpop.permute.xlu0 %182  ;;  %v78_v45 = vpop.permute.xlu2 %77 }
  0xa0   :  { %v190_v18 = vsel %vm188_vm2, %v183_v17, %v950_v4  ;;  %v191_v0 = vsel %vm188_vm2, %v952_v8, %v183_v17  ;;  %v204_v19 = vpop.permute.xlu1 %203  ;;  %v111_v17 = vperm.slane %v974_v22, 1 }
  0xa1   :  { %v197_v2 = vmul.f32 %v193_v5, %v191_v0  ;;  %v198_v20 = vmul.f32 %v194_v6, %v190_v18  ;;  %v211_v21 = vsel %vm209_vm3, %v204_v19, %v206_v38  ;;  %v212_v23 = vsel %vm209_vm3, %v202_v52, %v204_v19  ;;  %325 = vmatpush.bf16.msra.mxu3 %v255_v7 }
  0xa2   :  { %v218_v4 = vmul.f32 %v214_v15, %v212_v23  ;;  %v219_v8 = vmul.f32 %v215_v16, %v211_v21  ;;  %v90_v7 = vperm.slane %v974_v22, 0  ;;  %v130_v23 = vperm.slane %v1020_v60, 2 }
  0xa4   :  { %v256_v24 = vpack.c.bf16 %v218_v4, %v197_v2  ;;  %v257_v25 = vpack.c.bf16 %v219_v8, %v198_v20 }
  0xa6   :  { %285 = vmatpush.bf16.msra.mxu0 %v256_v24  ;;  %298 = vmatpush.bf16.msra.mxu1 %v257_v25  ;;  %v131_v24 = vperm.slane %v1022_v61, 2 }
  0xa7   :  { %v120_v26 = vpop.permute.xlu0 %119  ;;  %v118_v63 = vpop.permute.xlu2 %117 }
  0xa8   :  { %v122_v28 = vpop.permute.xlu1 %121  ;;  %v129_v25 = vsel %vm125_vm5, %v124_v27, %v118_v63 }
  0xa9   :  { %v127_v32 = vsel %vm125_vm5, %v120_v26, %v122_v28 }
  0xaa   :  { %v136_v39 = vmul.f32 %v132_v29, %v127_v32  ;;  %v152_v32 = vperm.slane %v1022_v61, 3 }
  0xaf   :  { %v143_v35 = vpop.permute.xlu0 %142  ;;  %v103_v4 = vpop.permute.xlu2 %102 }
  0xb0   :  { %v148_v37 = vsel %vm146_vm6, %v1028_v9, %v143_v35  ;;  %v162_v38 = vpop.permute.xlu1 %161 }
  0xb1   :  { %v157_v40 = vmul.f32 %v153_v30, %v148_v37  ;;  %v169_v41 = vsel %vm167_vm4, %v162_v38, %v164_v54  ;;  %v170_v43 = vsel %vm167_vm4, %v160_v44, %v162_v38  ;;  %v154_v54 = vperm.slane %v994_v42, 3 }
  0xb2   :  { %v176_v49 = vmul.f32 %v172_v33, %v170_v43  ;;  %v177_v50 = vmul.f32 %v173_v34, %v169_v41  ;;  %v126_v44 = vsel %vm125_vm5, %v122_v28, %v124_v27  ;;  %v151_v28 = vperm.slane %v1020_v60, 3 }
  0xb3   :  { %v250_v52 = vpack.c.bf16 %v157_v40, %v136_v39  ;;  %v112_v37 = vperm.slane %v994_v42, 1  ;;  %v91_v38 = vperm.slane %v994_v42, 0  ;;  %v243_v39 = vld [vmem:[%s1404_s2] sm:$0xf]  ;;  %v134_v41 = vmul.f32 %v130_v23, %v129_v25 }
  0xb4   :  { %v252_v53 = vpack.c.bf16 %v176_v49, %v874_v1  ;;  %v253_v55 = vpack.c.bf16 %v177_v50, %v890_v3  ;;  %v137_v1 = vmul.f32 %v133_v56, %v126_v44 }
  0xb5   :  { %313 = vmatpush.bf16.msra.mxu2 %v250_v52 }
  0xb6   :  { %286 = vmatpush.bf16.msra.mxu0 %v252_v53  ;;  %299 = vmatpush.bf16.msra.mxu1 %v253_v55 }
  0xb7   :  { %v145_v57 = vpop.permute.xlu0 %144 }
  0xb8   :  { %v147_v58 = vsel %vm146_vm6, %v143_v35, %v145_v57  ;;  %v76_v59 = vpop.permute.xlu1 %75  ;;  %v128_v35 = vsel %vm125_vm5, %v118_v63, %v120_v26  ;;  %v110_v63 = vperm.slane %v1022_v61, 1 }
  0xb9   :  { %v158_v3 = vmul.f32 %v154_v54, %v147_v58  ;;  %v85_v18 = vsel %vm83_vm7, %v76_v59, %v78_v45  ;;  %v135_v50 = vmul.f32 %v131_v24, %v128_v35 }
  0xba   :  { %v94_v20 = vmul.f32 %v90_v7, %v85_v18 }
  0xbb   :  { %v251_v62 = vpack.c.bf16 %v158_v3, %v137_v1  ;;  %v88_v3 = vperm.slane %v1020_v60, 0 }
  0xbd   :  { %326 = vmatpush.bf16.msra.mxu3 %v251_v62  ;;  %v89_v62 = vperm.slane %v1022_v61, 0 }
  0xbf   :  { %v99_v0 = vpop.permute.xlu0 %98 }
  0xc0   :  { %v101_v19 = vpop.permute.xlu1 %100 }
  0xc1   :  { %v106_v2 = vsel %vm104_vm8, %v99_v0, %v101_v19  ;;  %v105_v27 = vsel %vm104_vm8, %v101_v19, %v103_v4 }
  0xc2   :  { %v115_v21 = vmul.f32 %v111_v17, %v106_v2 }
  0xc4   :  { %v246_v8 = vpack.c.bf16 %v115_v21, %v94_v20 }
  0xc6   :  { %314 = vmatpush.bf16.msra.mxu2 %v246_v8 }
  0xc7   :  { %v139_v40 = vpop.permute.xlu0 %138 }
  0xc8   :  { %v149_v26 = vsel %vm146_vm6, %v139_v40, %v1028_v9  ;;  %v150_v43 = vsel %vm146_vm6, %v145_v57, %v139_v40  ;;  %v80_v49 = vpop.permute.xlu1 %79  ;;  %v116_v9 = vmul.f32 %v112_v37, %v105_v27 }
  0xc9   :  { %v155_v52 = vmul.f32 %v151_v28, %v150_v43  ;;  %v156_v53 = vmul.f32 %v152_v32, %v149_v26  ;;  %v84_v55 = vsel %vm83_vm7, %v78_v45, %v80_v49  ;;  %689 = vmatmul.msk.bf16.vlgmr.msra.gmra.mxu2 %vm264_vm9, %v243_v39  ;;  %v109_v45 = vperm.slane %v1020_v60, 1 }
  0xca   :  { %v95_v44 = vmul.f32 %v91_v38, %v84_v55 }
  0xcb   :  { %v248_v57 = vpack.c.bf16 %v155_v52, %v134_v41  ;;  %v249_v58 = vpack.c.bf16 %v156_v53, %v135_v50 }
  0xcc   :  { %v247_v1 = vpack.c.bf16 %v116_v9, %v95_v44 }
  0xcd   :  { %287 = vmatpush.bf16.msra.mxu0 %v248_v57  ;;  %300 = vmatpush.bf16.msra.mxu1 %v249_v58 }
  0xce   :  { %327 = vmatpush.bf16.msra.mxu3 %v247_v1 }
  0xcf   :  { %v74_v18 = vpop.permute.xlu0 %73 }
  0xd0   :  { %v86_v19 = vsel %vm83_vm7, %v74_v18, %v76_v59  ;;  %v87_v2 = vsel %vm83_vm7, %v80_v49, %v74_v18  ;;  %v97_v20 = vpop.permute.xlu1 %96 }
  0xd1   :  { %v92_v21 = vmul.f32 %v88_v3, %v87_v2  ;;  %v93_v8 = vmul.f32 %v89_v62, %v86_v19  ;;  %v107_v25 = vsel %vm104_vm8, %v97_v20, %v99_v0  ;;  %v108_v35 = vsel %vm104_vm8, %v103_v4, %v97_v20  ;;  %690 = vmatmul.msk.bf16.vlgmr.msra.gmra.mxu3 %vm264_vm9, %v243_v39 }
  0xd2   :  { %v113_v59 = vmul.f32 %v109_v45, %v108_v35  ;;  %v114_v27 = vmul.f32 %v110_v63, %v107_v25 }
  0xd4   :  { %v244_v40 = vpack.c.bf16 %v113_v59, %v92_v21  ;;  %v245_v41 = vpack.c.bf16 %v114_v27, %v93_v8 }
  0xd6   :  { %288 = vmatpush.bf16.msra.mxu0 %v244_v40  ;;  %301 = vmatpush.bf16.msra.mxu1 %v245_v41 }
  0xd9   :  { %687 = vmatmul.msk.bf16.vlgmr.msra.gmra.mxu0 %vm264_vm9, %v243_v39  ;;  %688 = vmatmul.msk.bf16.vlgmr.msra.gmra.mxu1 %vm264_vm9, %v243_v39  ;;  %v813_v39 = vmov 0  }
  0xda   :  { %709 = vset.pattern.permute.xlu1 %v813_v39  ;;  %710 = vset.pattern.permute.xlu0 %v813_v39 }
 0x14c   :  { %v316_v0 = vpop.f32.mrf.mxu2 }
 0x14d   :  { %v340_v50 = vmul.f32 %v316_v0, %v316_v0 }
 0x154   :  { %v329_v26 = vpop.f32.mrf.mxu3  ;;  %v318_v43 = vpop.f32.mrf.mxu2 }
 0x155   :  { %v341_v44 = vmul.f32 %v329_v26, %v329_v26 }
 0x156   :  { %v290_v4 = vpop.f32.mrf.mxu0  ;;  %v303_v49 = vpop.f32.mrf.mxu1 }
 0x157   :  { %v338_v52 = vmul.f32 %v290_v4, %v290_v4  ;;  %v333_v53 = vadd.f32 %v303_v49, %v290_v4  ;;  %v339_v55 = vmul.f32 %v303_v49, %v303_v49 }
 0x159   :  { %v334_v9 = vadd.f32 %v333_v53, %v316_v0  ;;  %v342_v57 = vadd.f32 %v339_v55, %v338_v52  ;;  %v351_v55 = vld [vmem:[%s1406_s4] sm:$0xff] }
 0x15b   :  { %v335_v58 = vadd.f32 %v334_v9, %v329_v26  ;;  %v343_v1 = vadd.f32 %v342_v57, %v340_v50 }
 0x15c   :  { %v331_v18 = vpop.f32.mrf.mxu3 }
 0x15d   :  { %336 = vadd.xlane.f32.xlu2 %v335_v58  ;;  %v344_v19 = vadd.f32 %v343_v1, %v341_v44  ;;  %v364_v1 = vld [vmem:[%s1407_s5] sm:$0xff] }
 0x15e   :  { %v292_v2 = vpop.f32.mrf.mxu0  ;;  %v305_v20 = vpop.f32.mrf.mxu1 }
 0x15f   :  { %345 = vadd.xlane.f32.xlu0 %v344_v19 }
 0x1d0   :  { %v337_v21 = vpop.xlane.xlu2 %336 }
 0x1d1   :  { %v347_v8 = vmul.f32 0.001953125, %v337_v21 }
 0x1d2   :  { %v346_v25 = vpop.xlane.xlu0 %345 }
 0x1d3   :  { %v349_v35 = vmul.f32 %v347_v8, %v347_v8  ;;  %v348_v59 = vmul.f32 0.001953125, %v346_v25 }
 0x1d5   :  { %v350_v27 = vsub.f32 %v348_v59, %v349_v35 }
 0x1d7   :  { %v352_v40 = vadd.f32 1e-05, %v350_v27 }
 0x1d9   :  { %715 = vrsqrt.f32 %v352_v40  ;;  %vm359_vm11 = vweird.f32 %v352_v40 }
 0x1df   :  { %v716_v41 = vpop.eup %715 }
 0x1e0   :  { %v354_v43 = vmul.f32 %v716_v41, %v352_v40  ;;  %vm360_vm10 = vweird.f32 %v716_v41 }
 0x1e1   :  { %vm361_vm12 = vmor %vm359_vm11, %vm360_vm10 }
 0x1e2   :  { %v355_v50 = vmul.f32 %v716_v41, %v354_v43 }
 0x1e4   :  { %v356_v52 = vmul.f32 0.5, %v355_v50 }
 0x1e6   :  { %v357_v53 = vsub.f32 1.5, %v356_v52 }
 0x1e8   :  { %v358_v9 = vmul.f32 %v716_v41, %v357_v53 }
 0x1ea   :  { %v362_v44 = vsel %vm361_vm12, %v716_v41, %v358_v9 }
 0x1eb   :  { %v363_v57 = vmul.f32 %v362_v44, %v351_v55 }
 0x1ed   :  { %369 = vperm.xlu1 %709, %v363_v57   ;;  %v365_v58 = vmul.f32 %v363_v57, %v347_v8 }
 0x1ef   :  { %v366_v18 = vsub.f32 %v364_v1, %v365_v58 }
 0x1f5   :  { %378 = vperm.xlu1 %709, %v366_v18  }
 0x25f   :  { %v370_v19 = vpop.permute.xlu1 %369 }
 0x260   :  { %v373_v2 = vmul.f32 %v370_v19, %v303_v49  ;;  %v374_v20 = vmul.f32 %v370_v19, %v316_v0  ;;  %v375_v39 = vmul.f32 %v370_v19, %v329_v26  ;;  %v372_v8 = vmul.f32 %v370_v19, %v290_v4 }
 0x267   :  { %v379_v21 = vpop.permute.xlu1 %378 }
 0x268   :  { %v382_v25 = vadd.f32 %v379_v21, %v373_v2  ;;  %v383_v35 = vadd.f32 %v379_v21, %v374_v20  ;;  %v384_v59 = vadd.f32 %v379_v21, %v375_v39  ;;  %v381_v0 = vadd.f32 %v379_v21, %v372_v8 }
 0x26a   :  { %v1161_v27 = vmax.f32 %v382_v25, 0.0  ;;  %v1163_v40 = vmax.f32 %v383_v35, 0.0  ;;  %v1165_v41 = vmax.f32 %v384_v59, 0.0  ;;  %v1173_v26 = vmax.f32 %v381_v0, 0.0 }
 0x26c   :  { %475 = vrot.lane.b32.xlu0 %v1165_v41, %s805_s3  ;;  %505 = vrot.lane.b32.xlu1 %v1163_v40, %s806_s20 }
 0x26d   :  { %503 = vrot.lane.b32.xlu2 %v1161_v27, %s806_s20 }
 0x274   :  { %507 = vrot.lane.b32.xlu1 %v1165_v41, %s806_s20  ;;  %485 = vrot.lane.b32.xlu0 %v1173_v26, %s807_s25 }
 0x275   :  { %469 = vrot.lane.b32.xlu2 %v1173_v26, %s805_s3 }
 0x27c   :  { %471 = vrot.lane.b32.xlu0 %v1161_v27, %s805_s3  ;;  %501 = vrot.lane.b32.xlu1 %v1173_v26, %s806_s20  ;;  %s814_s20 = smov [#allocation7]  }
 0x27d   :  { %459 = vrot.lane.b32.xlu2 %v1165_v41, %s808_s26  ;;  %s674_s21 = sshll.u32 %s814_s20, 4  ;;  %s675_s21 = int_to_ptr.vmem [resolvable:$true] %s674_s21 }
 0x284   :  { %423 = vrot.lane.b32.xlu0 %v1161_v27, %s809_s27  ;;  %473 = vrot.lane.b32.xlu1 %v1163_v40, %s805_s3 }
 0x285   :  { %453 = vrot.lane.b32.xlu2 %v1173_v26, %s808_s26 }
 0x28c   :  { %441 = vrot.lane.b32.xlu0 %v1163_v40, %s810_s28  ;;  %489 = vrot.lane.b32.xlu1 %v1163_v40, %s807_s25 }
 0x28d   :  { %439 = vrot.lane.b32.xlu2 %v1161_v27, %s810_s28 }
 0x294   :  { %443 = vrot.lane.b32.xlu0 %v1165_v41, %s810_s28  ;;  %491 = vrot.lane.b32.xlu1 %v1165_v41, %s807_s25 }
 0x295   :  { %427 = vrot.lane.b32.xlu2 %v1165_v41, %s809_s27 }
 0x29c   :  { %407 = vrot.lane.b32.xlu0 %v1161_v27, %s812_s30  ;;  %457 = vrot.lane.b32.xlu1 %v1163_v40, %s808_s26 }
 0x29d   :  { %393 = vrot.lane.b32.xlu2 %v1163_v40, %s811_s29 }
 0x2a4   :  { %437 = vrot.lane.b32.xlu0 %v1173_v26, %s810_s28  ;;  %487 = vrot.lane.b32.xlu1 %v1161_v27, %s807_s25 }
 0x2a5   :  { %421 = vrot.lane.b32.xlu2 %v1173_v26, %s809_s27 }
 0x2ac   :  { %389 = vrot.lane.b32.xlu0 %v1173_v26, %s811_s29  ;;  %425 = vrot.lane.b32.xlu1 %v1163_v40, %s809_s27 }
 0x2ad   :  { %411 = vrot.lane.b32.xlu2 %v1165_v41, %s812_s30 }
 0x2b4   :  { %455 = vrot.lane.b32.xlu1 %v1161_v27, %s808_s26 }
 0x2bc   :  { %391 = vrot.lane.b32.xlu1 %v1161_v27, %s811_s29 }
 0x2c4   :  { %409 = vrot.lane.b32.xlu1 %v1163_v40, %s812_s30 }
 0x2c7   :  { %v504_v4 = vpop.permute.xlu2 %503 }
 0x2cc   :  { %395 = vrot.lane.b32.xlu1 %v1165_v41, %s811_s29 }
 0x2cf   :  { %v470_v1 = vpop.permute.xlu2 %469 }
 0x2d4   :  { %405 = vrot.lane.b32.xlu1 %v1173_v26, %s812_s30 }
 0x2d7   :  { %v460_v59 = vpop.permute.xlu2 %459 }
 0x2de   :  { %v476_v49 = vpop.permute.xlu0 %475  ;;  %v506_v43 = vpop.permute.xlu1 %505 }
 0x2df   :  { %v510_v50 = vsel %vm230_vm0, %v504_v4, %v506_v43 }
 0x2e0   :  { %v514_v52 = vmul.f32 %v961_v13, %v510_v50 }
 0x2e2   :  { %v535_v53 = vpack.c.bf16 %v514_v52, %v514_v52 }
 0x2e4   :  { %v545_v55 = vsel %vm268_vm1, %v535_v53, 0 }
 0x2e5   :  { %569 = vmatpush.bf16.msrb.mxu1 %v545_v55 }
 0x2e6   :  { %v508_v9 = vpop.permute.xlu1 %507  ;;  %v486_v58 = vpop.permute.xlu0 %485 }
 0x2e7   :  { %v509_v44 = vsel %vm230_vm0, %v506_v43, %v508_v9 }
 0x2e8   :  { %v515_v57 = vmul.f32 %v957_v11, %v509_v44 }
 0x2ea   :  { %v536_v18 = vpack.c.bf16 %v515_v57, %v515_v57 }
 0x2ec   :  { %v548_v19 = vsel %vm268_vm1, %v536_v18, 0 }
 0x2ed   :  { %582 = vmatpush.bf16.msrb.mxu2 %v548_v19 }
 0x2ee   :  { %v502_v2 = vpop.permute.xlu1 %501  ;;  %v472_v25 = vpop.permute.xlu0 %471 }
 0x2ef   :  { %v511_v13 = vsel %vm230_vm0, %v502_v2, %v504_v4  ;;  %v512_v20 = vsel %vm230_vm0, %v508_v9, %v502_v2  ;;  %v1251_v4 = vpop.permute.xlu2 %453 }
 0x2f0   :  { %v513_v39 = vmul.f32 %v959_v12, %v511_v13  ;;  %v516_v21 = vmul.f32 %v963_v14, %v512_v20  ;;  %v480_v12 = vsel %vm188_vm2, %v476_v49, %v470_v1  ;;  %v464_v9 = vsel %vm167_vm4, %v460_v59, %v1251_v4 }
 0x2f1   :  { %v484_v18 = vmul.f32 %v480_v12, %v196_v46  ;;  %v468_v20 = vmul.f32 %v464_v9, %v175_v47  ;;  %v479_v47 = vsel %vm188_vm2, %v470_v1, %v472_v25 }
 0x2f2   :  { %v534_v35 = vpack.c.bf16 %v513_v39, %v513_v39  ;;  %v537_v11 = vpack.c.bf16 %v516_v21, %v516_v21 }
 0x2f3   :  { %v529_v46 = vpack.c.bf16 %v468_v20, %v1165_v41 }
 0x2f4   :  { %v542_v8 = vsel %vm268_vm1, %v534_v35, 0  ;;  %v551_v0 = vsel %vm268_vm1, %v537_v11, 0 }
 0x2f5   :  { %556 = vmatpush.bf16.msrb.mxu0 %v542_v8  ;;  %595 = vmatpush.bf16.msrb.mxu3 %v551_v0 }
 0x2f6   :  { %v474_v43 = vpop.permute.xlu1 %473  ;;  %v1249_v50 = vpop.permute.xlu0 %423 }
 0x2f7   :  { %v477_v14 = vsel %vm188_vm2, %v474_v43, %v476_v49  ;;  %v440_v19 = vpop.permute.xlu2 %439  ;;  %v478_v0 = vsel %vm188_vm2, %v472_v25, %v474_v43 }
 0x2f8   :  { %v483_v2 = vmul.f32 %v477_v14, %v195_v31 }
 0x2fe   :  { %v490_v52 = vpop.permute.xlu1 %489  ;;  %v442_v53 = vpop.permute.xlu0 %441 }
 0x2ff   :  { %v428_v8 = vpop.permute.xlu2 %427 }
 0x306   :  { %v492_v55 = vpop.permute.xlu1 %491  ;;  %v444_v31 = vpop.permute.xlu0 %443 }
 0x307   :  { %v493_v44 = vsel %vm209_vm3, %v490_v52, %v492_v55  ;;  %v496_v57 = vsel %vm209_vm3, %v492_v55, %v486_v58 }
 0x308   :  { %v499_v49 = vmul.f32 %v493_v44, %v216_v36  ;;  %v500_v13 = vmul.f32 %v496_v57, %v217_v48 }
 0x30a   :  { %v532_v39 = vpack.c.bf16 %v499_v49, %v483_v2  ;;  %v533_v21 = vpack.c.bf16 %v500_v13, %v484_v18 }
 0x30c   :  { %583 = vmatpush.bf16.msrb.mxu2 %v532_v39  ;;  %596 = vmatpush.bf16.msrb.mxu3 %v533_v21 }
 0x30e   :  { %v458_v35 = vpop.permute.xlu1 %457  ;;  %v1296_v25 = vpop.permute.xlu0 %407 }
 0x30f   :  { %v461_v11 = vsel %vm167_vm4, %v458_v35, %v460_v59 }
 0x310   :  { %v467_v36 = vmul.f32 %v461_v11, %v174_v51  ;;  %597 = vmatpush.bf16.msrb.mxu3 %v529_v46  ;;  %v481_v51 = vmul.f32 %v479_v47, %v193_v5  ;;  %v445_v5 = vsel %vm146_vm6, %v442_v53, %v444_v31  ;;  %v517_v47 = vld [vmem:[#allocation5] sm:$0xf] }
 0x311   :  { %v452_v44 = vmul.f32 %v445_v5, %v154_v54 }
 0x312   :  { %v528_v48 = vpack.c.bf16 %v467_v36, %v1163_v40  ;;  %v482_v40 = vmul.f32 %v478_v0, %v194_v6 }
 0x314   :  { %584 = vmatpush.bf16.msrb.mxu2 %v528_v48 }
 0x316   :  { %v488_v12 = vpop.permute.xlu1 %487  ;;  %v438_v49 = vpop.permute.xlu0 %437 }
 0x317   :  { %v494_v41 = vsel %vm209_vm3, %v488_v12, %v490_v52  ;;  %v495_v59 = vsel %vm209_vm3, %v486_v58, %v488_v12  ;;  %v394_v52 = vpop.permute.xlu2 %393  ;;  %v446_v58 = vsel %vm146_vm6, %v440_v19, %v442_v53  ;;  %v447_v39 = vsel %vm146_vm6, %v438_v49, %v440_v19 }
 0x318   :  { %v497_v14 = vmul.f32 %v495_v59, %v214_v15  ;;  %v498_v1 = vmul.f32 %v494_v41, %v215_v16  ;;  %v451_v9 = vmul.f32 %v446_v58, %v153_v30  ;;  %v448_v30 = vsel %vm146_vm6, %v444_v31, %v438_v49 }
 0x319   :  { %v450_v11 = vmul.f32 %v447_v39, %v152_v32 }
 0x31a   :  { %v530_v43 = vpack.c.bf16 %v497_v14, %v481_v51  ;;  %v531_v55 = vpack.c.bf16 %v498_v1, %v482_v40 }
 0x31c   :  { %557 = vmatpush.bf16.msrb.mxu0 %v530_v43  ;;  %570 = vmatpush.bf16.msrb.mxu1 %v531_v55 }
 0x31e   :  { %v426_v6 = vpop.permute.xlu1 %425 }
 0x31f   :  { %v429_v15 = vsel %vm125_vm5, %v426_v6, %v428_v8  ;;  %v430_v16 = vsel %vm125_vm5, %v1249_v50, %v426_v6  ;;  %v422_v13 = vpop.permute.xlu2 %421 }
 0x320   :  { %v435_v57 = vmul.f32 %v430_v16, %v132_v29  ;;  %v436_v53 = vmul.f32 %v429_v15, %v133_v56  ;;  %v431_v19 = vsel %vm125_vm5, %v422_v13, %v1249_v50  ;;  %v432_v46 = vsel %vm125_vm5, %v428_v8, %v422_v13 }
 0x321   :  { %v434_v31 = vmul.f32 %v431_v19, %v131_v24 }
 0x322   :  { %v524_v18 = vpack.c.bf16 %v451_v9, %v435_v57  ;;  %v525_v2 = vpack.c.bf16 %v452_v44, %v436_v53 }
 0x323   :  { %v523_v8 = vpack.c.bf16 %v450_v11, %v434_v31  ;;  %v623_v11 = vld [vmem:[%s1408_s6] sm:$0xff] }
 0x324   :  { %585 = vmatpush.bf16.msrb.mxu2 %v524_v18  ;;  %598 = vmatpush.bf16.msrb.mxu3 %v525_v2 }
 0x326   :  { %v456_v20 = vpop.permute.xlu1 %455 }
 0x327   :  { %v462_v54 = vsel %vm167_vm4, %v456_v20, %v458_v35  ;;  %v463_v29 = vsel %vm167_vm4, %v1251_v4, %v456_v20  ;;  %v449_v35 = vmul.f32 %v448_v30, %v151_v28  ;;  %v412_v48 = vpop.permute.xlu2 %411 }
 0x328   :  { %v465_v56 = vmul.f32 %v463_v29, %v172_v33  ;;  %v466_v21 = vmul.f32 %v462_v54, %v173_v34  ;;  %v433_v34 = vmul.f32 %v432_v46, %v130_v23 }
 0x32a   :  { %v526_v4 = vpack.c.bf16 %v465_v56, %v1173_v26  ;;  %v527_v33 = vpack.c.bf16 %v466_v21, %v1161_v27  ;;  %v522_v36 = vpack.c.bf16 %v449_v35, %v433_v34 }
 0x32c   :  { %558 = vmatpush.bf16.msrb.mxu0 %v526_v4  ;;  %571 = vmatpush.bf16.msrb.mxu1 %v527_v33 }
 0x32e   :  { %v392_v50 = vpop.permute.xlu1 %391 }
 0x32f   :  { %v398_v28 = vsel %vm83_vm7, %v392_v50, %v394_v52 }
 0x330   :  { %559 = vmatpush.bf16.msrb.mxu0 %v522_v36  ;;  %572 = vmatpush.bf16.msrb.mxu1 %v523_v8  ;;  %v403_v23 = vmul.f32 %v398_v28, %v90_v7 }
 0x336   :  { %v410_v32 = vpop.permute.xlu1 %409 }
 0x337   :  { %v414_v27 = vsel %vm104_vm8, %v1296_v25, %v410_v32  ;;  %v413_v0 = vsel %vm104_vm8, %v410_v32, %v412_v48 }
 0x338   :  { %v419_v24 = vmul.f32 %v414_v27, %v111_v17  ;;  %v420_v59 = vmul.f32 %v413_v0, %v112_v37  ;;  %v390_v17 = vpop.permute.xlu0 %389 }
 0x339   :  { %v399_v51 = vsel %vm83_vm7, %v390_v17, %v392_v50  ;;  %v636_v50 = vld [vmem:[%s1409_s7] sm:$0xff] }
 0x33a   :  { %v520_v26 = vpack.c.bf16 %v419_v24, %v403_v23  ;;  %v402_v42 = vmul.f32 %v399_v51, %v89_v62  ;;  %v722_v51 = vld [vmem:[%s1402_s0 + $0x18] sm:$0xff] }
 0x33c   :  { %586 = vmatpush.bf16.msrb.mxu2 %v520_v26 }
 0x33e   :  { %v396_v12 = vpop.permute.xlu1 %395 }
 0x33f   :  { %v397_v41 = vsel %vm83_vm7, %v394_v52, %v396_v12  ;;  %693 = vmatmul.msk.bf16.vlgmr.msrb.gmra.mxu2 %vm264_vm9, %v517_v47  ;;  %v400_v40 = vsel %vm83_vm7, %v396_v12, %v390_v17  ;;  %v719_v12 = vld [vmem:[%s1402_s0] sm:$0xff] }
 0x340   :  { %v404_v22 = vmul.f32 %v397_v41, %v91_v38  ;;  %v401_v38 = vmul.f32 %v400_v40, %v88_v3 }
 0x342   :  { %v521_v7 = vpack.c.bf16 %v420_v59, %v404_v22  ;;  %v720_v59 = vld [vmem:[%s1402_s0 + $0x8] sm:$0xff] }
 0x344   :  { %599 = vmatpush.bf16.msrb.mxu3 %v521_v7  ;;  %v721_v7 = vld [vmem:[%s1402_s0 + $0x10] sm:$0xff] }
 0x346   :  { %v406_v14 = vpop.permute.xlu1 %405 }
 0x347   :  { %v415_v1 = vsel %vm104_vm8, %v406_v14, %v1296_v25  ;;  %v416_v37 = vsel %vm104_vm8, %v412_v48, %v406_v14  ;;  %694 = vmatmul.msk.bf16.vlgmr.msrb.gmra.mxu3 %vm264_vm9, %v517_v47 }
 0x348   :  { %v417_v43 = vmul.f32 %v416_v37, %v109_v45  ;;  %v418_v55 = vmul.f32 %v415_v1, %v110_v63 }
 0x34a   :  { %v518_v52 = vpack.c.bf16 %v417_v43, %v401_v38  ;;  %v519_v58 = vpack.c.bf16 %v418_v55, %v402_v42 }
 0x34c   :  { %560 = vmatpush.bf16.msrb.mxu0 %v518_v52  ;;  %573 = vmatpush.bf16.msrb.mxu1 %v519_v58 }
 0x34f   :  { %691 = vmatmul.msk.bf16.vlgmr.msrb.gmra.mxu0 %vm264_vm9, %v517_v47  ;;  %692 = vmatmul.msk.bf16.vlgmr.msrb.gmra.mxu1 %vm264_vm9, %v517_v47 }
 0x3c2   :  { %v588_v10 = vpop.f32.mrf.mxu2 }
 0x3c3   :  { %v612_v3 = vmul.f32 %v588_v10, %v588_v10 }
 0x3ca   :  { %v601_v25 = vpop.f32.mrf.mxu3  ;;  %v590_v62 = vpop.f32.mrf.mxu2 }
 0x3cb   :  { %v613_v61 = vmul.f32 %v601_v25, %v601_v25 }
 0x3cc   :  { %v562_v5 = vpop.f32.mrf.mxu0  ;;  %v575_v6 = vpop.f32.mrf.mxu1 }
 0x3cd   :  { %v610_v15 = vmul.f32 %v562_v5, %v562_v5  ;;  %v605_v60 = vadd.f32 %v575_v6, %v562_v5  ;;  %v611_v45 = vmul.f32 %v575_v6, %v575_v6 }
 0x3cf   :  { %v606_v16 = vadd.f32 %v605_v60, %v588_v10  ;;  %v614_v63 = vadd.f32 %v611_v45, %v610_v15 }
 0x3d1   :  { %v607_v9 = vadd.f32 %v606_v16, %v601_v25  ;;  %v615_v44 = vadd.f32 %v614_v63, %v612_v3 }
 0x3d2   :  { %v603_v57 = vpop.f32.mrf.mxu3 }
 0x3d3   :  { %608 = vadd.xlane.f32.xlu2 %v607_v9  ;;  %v616_v53 = vadd.f32 %v615_v44, %v613_v61 }
 0x3d4   :  { %v564_v18 = vpop.f32.mrf.mxu0  ;;  %v577_v2 = vpop.f32.mrf.mxu1 }
 0x3d5   :  { %617 = vadd.xlane.f32.xlu0 %v616_v53 }
 0x446   :  { %v609_v49 = vpop.xlane.xlu2 %608 }
 0x447   :  { %v619_v13 = vmul.f32 0.001953125, %v609_v49 }
 0x448   :  { %v618_v20 = vpop.xlane.xlu0 %617 }
 0x449   :  { %v621_v39 = vmul.f32 %v619_v13, %v619_v13  ;;  %v620_v30 = vmul.f32 0.001953125, %v618_v20 }
 0x44b   :  { %v622_v54 = vsub.f32 %v620_v30, %v621_v39 }
 0x44d   :  { %v624_v29 = vadd.f32 1e-05, %v622_v54 }
 0x44f   :  { %717 = vrsqrt.f32 %v624_v29  ;;  %vm631_vm14 = vweird.f32 %v624_v29 }
 0x455   :  { %v718_v56 = vpop.eup %717 }
 0x456   :  { %v626_v21 = vmul.f32 %v718_v56, %v624_v29  ;;  %vm632_vm13 = vweird.f32 %v718_v56 }
 0x457   :  { %vm633_vm15 = vmor %vm631_vm14, %vm632_vm13 }
 0x458   :  { %v627_v19 = vmul.f32 %v718_v56, %v626_v21 }
 0x45a   :  { %v628_v46 = vmul.f32 0.5, %v627_v19 }
 0x45c   :  { %v629_v35 = vsub.f32 1.5, %v628_v46 }
 0x45e   :  { %v630_v4 = vmul.f32 %v718_v56, %v629_v35 }
 0x460   :  { %v634_v33 = vsel %vm633_vm15, %v718_v56, %v630_v4 }
 0x461   :  { %v635_v34 = vmul.f32 %v634_v33, %v623_v11 }
 0x463   :  { %641 = vperm.xlu1 %709, %v635_v34   ;;  %v637_v31 = vmul.f32 %v635_v34, %v619_v13 }
 0x465   :  { %v638_v36 = vsub.f32 %v636_v50, %v637_v31 }
 0x46b   :  { %650 = vperm.xlu1 %709, %v638_v36  }
 0x4d5   :  { %v642_v8 = vpop.permute.xlu1 %641 }
 0x4d6   :  { %v644_v28 = vmul.f32 %v642_v8, %v562_v5  ;;  %v645_v32 = vmul.f32 %v642_v8, %v575_v6  ;;  %v646_v27 = vmul.f32 %v642_v8, %v588_v10  ;;  %v647_v23 = vmul.f32 %v642_v8, %v601_v25 }
 0x4dd   :  { %v651_v24 = vpop.permute.xlu1 %650 }
 0x4de   :  { %v653_v26 = vadd.f32 %v651_v24, %v644_v28  ;;  %v654_v48 = vadd.f32 %v651_v24, %v645_v32  ;;  %v655_v47 = vadd.f32 %v651_v24, %v646_v27  ;;  %v656_v0 = vadd.f32 %v651_v24, %v647_v23 }
 0x4e0   :  { %v657_v41 = vadd.f32 %v719_v12, %v653_v26  ;;  %v658_v22 = vadd.f32 %v720_v59, %v654_v48  ;;  %v659_v17 = vadd.f32 %v721_v7, %v655_v47  ;;  %v660_v40 = vadd.f32 %v722_v51, %v656_v0 }
 0x4e2   :  { %v661_v14 = vmax.f32 %v657_v41, 0.0  ;;  %v662_v1 = vmax.f32 %v658_v22, 0.0  ;;  %v663_v37 = vmax.f32 %v659_v17, 0.0  ;;  %v664_v42 = vmax.f32 %v660_v40, 0.0 }
 0x4e4   :  { %665 = vst [vmem:[#allocation7] sm:$0xff] %v661_v14 }
 0x4e5   :  { %666 = vst [vmem:[#allocation7 + $0x8] sm:$0xff] %v662_v1 }
 0x4e6   :  { %667 = vst [vmem:[#allocation7 + $0x10] sm:$0xff] %v663_v37 }
 0x4e7   :  { %668 = vst [vmem:[#allocation7 + $0x18] sm:$0xff] %v664_v42 }
 0x4e8   :  { %679 = dma.vmem_to_hbm [thread:$0]  %s675_s21, 512, %s677_s24, [#allocation4]  }
 0x4e9   :  { %799 = dma.done.wait [#allocation4], 512  }
 0x4ea   :  { %800 = vsyncadd [#allocation4], 4294966784 }
 0x4eb   :  { %684 = vsyncpa [#allocation3], 1 }
 0x4ec   :  { %685 = vsyncpa [#allocation6], 1 }
 0x4ed   :  { %686 = vsyncpa [#allocation4], 1 }

</bundles_post_ra>
